<compile_context>
chip_gen: v6e
topology: v6e:2x2x1
jax: 0.10.0
libtpu: 0.0.40
codegen_flags: <defaults>
</compile_context>

<pallas_src>
import math

import jax
import jax.numpy as jnp
from jax.experimental import pallas as pl
from jax.experimental.pallas import tpu as pltpu

INPUT_DIM = 1
HIDDEN_DIM = 20
OUTPUT_DIM = 7
NUM_HIDDEN = 1  # module default; the kernel hard-codes a single hidden layer


def _pinn_fwd_kernel(t_ref, w_in_ref, b_in_ref, w_h_ref, b_h_ref,
                     w_out_ref, b_out_ref, o_ref):
    # Layout: features on sublanes, batch on lanes.
    #   t_ref     : (1, B)            tile of time points
    #   w_in_ref  : (HIDDEN, 1)       torch (out, in) layout
    #   b_in_ref  : (HIDDEN, 1)
    #   w_h_ref   : (HIDDEN, HIDDEN)
    #   b_h_ref   : (HIDDEN, 1)
    #   w_out_ref : (OUT, HIDDEN)
    #   b_out_ref : (OUT, 1)
    #   o_ref     : (OUT, B)
    t = t_ref[...]                                              # (1, B)

    # Layer 1: K == 1 => outer product. Do it on the VPU as a broadcast multiply
    # instead of paying MXU pipeline/drain latency for zero reuse.
    u = jnp.tanh(w_in_ref[...] * t + b_in_ref[...])             # (HIDDEN, B)

    # Hidden layer (num_hidden == 1): MXU matmul with lane-dense N == B.
    u = jnp.tanh(
        jnp.dot(w_h_ref[...], u, preferred_element_type=jnp.float32)
        + b_h_ref[...]
    )                                                           # (HIDDEN, B)

    # Output layer (no activation). (OUT, B) store is lane-dense / unmasked.
    o_ref[...] = (
        jnp.dot(w_out_ref[...], u, preferred_element_type=jnp.float32)
        + b_out_ref[...]
    ).astype(o_ref.dtype)


def pinn_forward(t, params, *, batch_tile=1024):
    """t: (N, INPUT_DIM) float32 -> (N, OUTPUT_DIM) float32."""
    w_in, b_in, w_h, b_h, w_out, b_out = params
    n = t.shape[0]
    assert t.shape == (n, INPUT_DIM)
    assert batch_tile % 128 == 0, "batch_tile must be a multiple of 128 (lane width)"

    # Batch-on-lane layout: (N, 1) -> (1, N); pad N so every tile is lane-dense.
    n_lane = ((n + 127) // 128) * 128
    tile = min(batch_tile, n_lane)
    n_pad = ((n + tile - 1) // tile) * tile

    t_l = jnp.pad(t.astype(jnp.float32).T, ((0, 0), (0, n_pad - n)))   # (1, n_pad)

    grid = (n_pad // tile,)

    def rep(shape):
        # Constant index_map: Pallas DMAs these tiny operands once and keeps the
        # same VMEM block resident for every grid step.
        return pl.BlockSpec(shape, lambda i: (0, 0))

    out_t = pl.pallas_call(
        _pinn_fwd_kernel,
        out_shape=jax.ShapeDtypeStruct((OUTPUT_DIM, n_pad), jnp.float32),
        grid_spec=pltpu.PrefetchScalarGridSpec(
            num_scalar_prefetch=0,
            grid=grid,
            in_specs=[
                pl.BlockSpec((INPUT_DIM, tile), lambda i: (0, i)),    # t tile
                rep((HIDDEN_DIM, INPUT_DIM)),     # W_in  (out, in)
                rep((HIDDEN_DIM, 1)),             # b_in
                rep((HIDDEN_DIM, HIDDEN_DIM)),    # W_h   (out, in)
                rep((HIDDEN_DIM, 1)),             # b_h
                rep((OUTPUT_DIM, HIDDEN_DIM)),    # W_out (out, in)
                rep((OUTPUT_DIM, 1)),             # b_out
            ],
            out_specs=pl.BlockSpec((OUTPUT_DIM, tile), lambda i: (0, i)),
        ),
        compiler_params=pltpu.CompilerParams(
            dimension_semantics=("parallel",)
        ),
    )(t_l, w_in, b_in, w_h, b_h, w_out, b_out)

    # Back to the module's (N, OUTPUT_DIM) layout, dropping padding.
    return out_t[:, :n].T


def xavier_uniform(key, fan_out, fan_in):
    # matches nn.init.xavier_uniform_ on torch's (out, in) weight layout
    bound = math.sqrt(6.0 / (fan_in + fan_out))
    return jax.random.uniform(key, (fan_out, fan_in), jnp.float32, -bound, bound)


def init_params(key):
    k1, k2, k3 = jax.random.split(key, 3)
    w_in = xavier_uniform(k1, HIDDEN_DIM, INPUT_DIM)     # (20, 1)
    b_in = jnp.zeros((HIDDEN_DIM, 1), jnp.float32)
    w_h = xavier_uniform(k2, HIDDEN_DIM, HIDDEN_DIM)     # (20, 20)
    b_h = jnp.zeros((HIDDEN_DIM, 1), jnp.float32)
    w_out = xavier_uniform(k3, OUTPUT_DIM, HIDDEN_DIM)   # (7, 20)
    b_out = jnp.zeros((OUTPUT_DIM, 1), jnp.float32)
    return (w_in, b_in, w_h, b_h, w_out, b_out)


def pinn_forward_ref(t, params):
    w_in, b_in, w_h, b_h, w_out, b_out = params
    u = jnp.tanh(t @ w_in.T + b_in.T)
    u = jnp.tanh(u @ w_h.T + b_h.T)
    return u @ w_out.T + b_out.T


# TODO(synk): MVP()/loss() require autograd through the network (d forward / d t);
# only the forward pass is implemented as a Pallas kernel here.

if __name__ == "__main__":
    key = jax.random.PRNGKey(0)
    kp, kt1, kt2 = jax.random.split(key, 3)

    params = init_params(kp)

    # Small batch of scalar time points, shape (8, 1) (matches module usage).
    t_small = jax.random.uniform(kt1, (8, INPUT_DIM), jnp.float32, 0.0, 10.0)
    out_small = jax.block_until_ready(pinn_forward(t_small, params))
    ref_small = pinn_forward_ref(t_small, params)
    assert out_small.shape == (8, OUTPUT_DIM)
    assert jnp.allclose(out_small, ref_small, atol=1e-5, rtol=1e-5)

    # Ragged N (not a multiple of the tile) exercises padding + multi-step grid.
    t_ragged = jax.random.uniform(kt2, (1000, INPUT_DIM), jnp.float32, 0.0, 10.0)
    out_ragged = jax.block_until_ready(
        pinn_forward(t_ragged, params, batch_tile=256))
    ref_ragged = pinn_forward_ref(t_ragged, params)
    assert out_ragged.shape == (1000, OUTPUT_DIM)
    assert jnp.allclose(out_ragged, ref_ragged, atol=1e-5, rtol=1e-5)

    print("KERNEL_OK")
</pallas_src>

<mosaic_0001>
module attributes {stable_mosaic.version = 11 : i64} {
  func.func @_pinn_fwd_kernel(%arg0: i32, %arg1: memref<1x128xf32, #tpu.memory_space<vmem>>, %arg2: memref<20x1xf32, #tpu.memory_space<vmem>>, %arg3: memref<20x1xf32, #tpu.memory_space<vmem>>, %arg4: memref<20x20xf32, #tpu.memory_space<vmem>>, %arg5: memref<20x1xf32, #tpu.memory_space<vmem>>, %arg6: memref<7x20xf32, #tpu.memory_space<vmem>>, %arg7: memref<7x1xf32, #tpu.memory_space<vmem>>, %arg8: memref<7x128xf32, #tpu.memory_space<vmem>>) attributes {dimension_semantics = [#tpu.dimension_semantics<parallel>], iteration_bounds = array<i64: 1>, scalar_prefetch = 0 : i64, scratch_operands = 0 : i64, tpu.core_type = #tpu.core_type<tc>, window_params = [{transform_indices = @transform_0, window_bounds = array<i64: 1, 128>}, {pipeline_mode = #tpu.pipeline_mode<synchronous>, transform_indices = @transform_1, window_bounds = array<i64: 20, 1>}, {pipeline_mode = #tpu.pipeline_mode<synchronous>, transform_indices = @transform_2, window_bounds = array<i64: 20, 1>}, {pipeline_mode = #tpu.pipeline_mode<synchronous>, transform_indices = @transform_3, window_bounds = array<i64: 20, 20>}, {pipeline_mode = #tpu.pipeline_mode<synchronous>, transform_indices = @transform_4, window_bounds = array<i64: 20, 1>}, {pipeline_mode = #tpu.pipeline_mode<synchronous>, transform_indices = @transform_5, window_bounds = array<i64: 7, 20>}, {pipeline_mode = #tpu.pipeline_mode<synchronous>, transform_indices = @transform_6, window_bounds = array<i64: 7, 1>}, {transform_indices = @transform_7, window_bounds = array<i64: 7, 128>}]} {
    %c0 = arith.constant 0 : index
    %c0_0 = arith.constant 0 : index
    %0 = vector.load %arg1[%c0, %c0_0] : memref<1x128xf32, #tpu.memory_space<vmem>>, vector<1x128xf32>
    %c0_1 = arith.constant 0 : index
    %c0_2 = arith.constant 0 : index
    %1 = vector.load %arg2[%c0_1, %c0_2] : memref<20x1xf32, #tpu.memory_space<vmem>>, vector<20x1xf32>
    %2 = vector.broadcast %1 : vector<20x1xf32> to vector<20x128xf32>
    %3 = vector.broadcast %0 : vector<1x128xf32> to vector<20x128xf32>
    %4 = arith.mulf %2, %3 : vector<20x128xf32>
    %c0_3 = arith.constant 0 : index
    %c0_4 = arith.constant 0 : index
    %5 = vector.load %arg3[%c0_3, %c0_4] : memref<20x1xf32, #tpu.memory_space<vmem>>, vector<20x1xf32>
    %6 = vector.broadcast %5 : vector<20x1xf32> to vector<20x128xf32>
    %7 = arith.addf %4, %6 : vector<20x128xf32>
    %8 = math.tanh %7 : vector<20x128xf32>
    %c0_5 = arith.constant 0 : index
    %c0_6 = arith.constant 0 : index
    %9 = vector.load %arg4[%c0_5, %c0_6] : memref<20x20xf32, #tpu.memory_space<vmem>>, vector<20x20xf32>
    %cst = arith.constant dense<0.000000e+00> : vector<20x128xf32>
    %10 = tpu.matmul %9, %8, %cst {dimension_numbers = #tpu.dot_dimension_numbers<[1], [0], [0], [1], [0, 0, 1, 1], [], []>} : vector<20x20xf32>, vector<20x128xf32>, vector<20x128xf32> -> vector<20x128xf32>
    %c0_7 = arith.constant 0 : index
    %c0_8 = arith.constant 0 : index
    %11 = vector.load %arg5[%c0_7, %c0_8] : memref<20x1xf32, #tpu.memory_space<vmem>>, vector<20x1xf32>
    %12 = vector.broadcast %11 : vector<20x1xf32> to vector<20x128xf32>
    %13 = arith.addf %10, %12 : vector<20x128xf32>
    %14 = math.tanh %13 : vector<20x128xf32>
    %c0_9 = arith.constant 0 : index
    %c0_10 = arith.constant 0 : index
    %15 = vector.load %arg6[%c0_9, %c0_10] : memref<7x20xf32, #tpu.memory_space<vmem>>, vector<7x20xf32>
    %cst_11 = arith.constant dense<0.000000e+00> : vector<7x128xf32>
    %16 = tpu.matmul %15, %14, %cst_11 {dimension_numbers = #tpu.dot_dimension_numbers<[1], [0], [0], [1], [0, 0, 1, 1], [], []>} : vector<7x20xf32>, vector<20x128xf32>, vector<7x128xf32> -> vector<7x128xf32>
    %c0_12 = arith.constant 0 : index
    %c0_13 = arith.constant 0 : index
    %17 = vector.load %arg7[%c0_12, %c0_13] : memref<7x1xf32, #tpu.memory_space<vmem>>, vector<7x1xf32>
    %18 = vector.broadcast %17 : vector<7x1xf32> to vector<7x128xf32>
    %19 = arith.addf %16, %18 : vector<7x128xf32>
    %c0_14 = arith.constant 0 : index
    %c0_15 = arith.constant 0 : index
    %20 = vector.load %arg8[%c0_14, %c0_15] : memref<7x128xf32, #tpu.memory_space<vmem>>, vector<7x128xf32>
    tpu.vector_store %arg8[%c0_14, %c0_15], %19 {strides = array<i32>} : memref<7x128xf32, #tpu.memory_space<vmem>>, vector<7x128xf32>,
    return
  }
  func.func @transform_0(%arg0: i32) -> (i32, i32) {
    %c0_i32 = arith.constant 0 : i32
    %c0_i32_0 = arith.constant 0 : i32
    return %c0_i32, %arg0 : i32, i32
  }
  func.func @transform_1(%arg0: i32) -> (i32, i32) {
    %c0_i32 = arith.constant 0 : i32
    %c0_i32_0 = arith.constant 0 : i32
    %c0_i32_1 = arith.constant 0 : i32
    return %c0_i32, %c0_i32_0 : i32, i32
  }
  func.func @transform_2(%arg0: i32) -> (i32, i32) {
    %c0_i32 = arith.constant 0 : i32
    %c0_i32_0 = arith.constant 0 : i32
    %c0_i32_1 = arith.constant 0 : i32
    return %c0_i32, %c0_i32_0 : i32, i32
  }
  func.func @transform_3(%arg0: i32) -> (i32, i32) {
    %c0_i32 = arith.constant 0 : i32
    %c0_i32_0 = arith.constant 0 : i32
    %c0_i32_1 = arith.constant 0 : i32
    return %c0_i32, %c0_i32_0 : i32, i32
  }
  func.func @transform_4(%arg0: i32) -> (i32, i32) {
    %c0_i32 = arith.constant 0 : i32
    %c0_i32_0 = arith.constant 0 : i32
    %c0_i32_1 = arith.constant 0 : i32
    return %c0_i32, %c0_i32_0 : i32, i32
  }
  func.func @transform_5(%arg0: i32) -> (i32, i32) {
    %c0_i32 = arith.constant 0 : i32
    %c0_i32_0 = arith.constant 0 : i32
    %c0_i32_1 = arith.constant 0 : i32
    return %c0_i32, %c0_i32_0 : i32, i32
  }
  func.func @transform_6(%arg0: i32) -> (i32, i32) {
    %c0_i32 = arith.constant 0 : i32
    %c0_i32_0 = arith.constant 0 : i32
    %c0_i32_1 = arith.constant 0 : i32
    return %c0_i32, %c0_i32_0 : i32, i32
  }
  func.func @transform_7(%arg0: i32) -> (i32, i32) {
    %c0_i32 = arith.constant 0 : i32
    %c0_i32_0 = arith.constant 0 : i32
    return %c0_i32, %arg0 : i32, i32
  }
}

</mosaic_0001>

<bundles_post_ra>
// kernel: tpu_custom_call.1
= control target key start
LH: loop header
LB: loop body
LE: loop exit
PB: predicated region body
PF: predicated region fallthrough
CT: control target
= control target key end

     0   :  { %v376_v2 = vmov 0   ;;  %s488_s0 = inlined_call_operand.vmem [shape: f32[1,128], index: 0, kind: input, shape index: {}]   ;;  %s489_s1 = inlined_call_operand.vmem [shape: f32[20,1], index: 1, kind: input, shape index: {}]   ;;  %s490_s2 = inlined_call_operand.vmem [shape: f32[20,1], index: 2, kind: input, shape index: {}]   ;;  %s491_s3 = inlined_call_operand.vmem [shape: f32[20,20], index: 3, kind: input, shape index: {}]   ;;  %s492_s4 = inlined_call_operand.vmem [shape: f32[20,1], index: 4, kind: input, shape index: {}]   ;;  %s493_s5 = inlined_call_operand.vmem [shape: f32[7,20], index: 5, kind: input, shape index: {}]   ;;  %s494_s6 = inlined_call_operand.vmem [shape: f32[7,1], index: 6, kind: input, shape index: {}]   ;;  %s495_s7 = inlined_call_operand.hbm [shape: f32[7,128], index: 7, kind: output, shape index: {}]  }
   0x1   :  { %v57_v0 = vld [vmem:[%s490_s2 + $0x10] sm:$0xf]  ;;  %341 = vset.pattern.permute.xlu1 %v376_v2  ;;  %340 = vset.pattern.permute.xlu0 %v376_v2  ;;  %v29_v3 = vld [vmem:[%s489_s1 + $0x8] sm:$0xff]  ;;  %v28_v4 = vld [vmem:[%s489_s1] sm:$0xff] }
   0x2   :  { %v30_v1 = vld [vmem:[%s489_s1 + $0x10] sm:$0xf]  ;;  %70 = vperm.xlu1 %341, %v57_v0  }
   0x3   :  { %43 = vperm.xlu0 %340, %v30_v1  }
   0x4   :  { %12 = vsyncpa [#allocation3], 0  ;;  %v56_v5 = vld [vmem:[%s490_s2 + $0x8] sm:$0xff]  ;;  %v55_v6 = vld [vmem:[%s490_s2] sm:$0xff]  ;;  %v377_v11 = vmov 0.0   ;;  %vm378_vm0 = vmmov 0  }
   0x5   :  { %v84_v7 = vld [vmem:[%s492_s4 + $0x10] sm:$0xf]  ;;  %v83_v8 = vld [vmem:[%s492_s4 + $0x8] sm:$0xff]  ;;  %v82_v9 = vld [vmem:[%s492_s4] sm:$0xff]  ;;  %312 = vmatprep.subr.mxu0 %v377_v11  ;;  %327 = vmatprep.subr.mxu1 %v377_v11  ;;  %vm110_vm1 = vcmask 1043456   ;;  %vm100_vm2 = vcmask 162816  }
   0x6   :  { %33 = vperm.xlu1 %341, %v28_v4   ;;  %v198_v10 = vld [vmem:[%s494_s6] sm:$0x7f]  ;;  %318 = vmatprep.mubr.msk.f32.mxu0 %vm378_vm0, %v377_v11  ;;  %v80_v29 = vld [vmem:[%s491_s3 + $0x8] sm:$0xff]  ;;  %v81_v30 = vld [vmem:[%s491_s3 + $0x10] sm:$0xf]  ;;  %s379_s25 = smov [#allocation2]  }
   0x7   :  { %38 = vperm.xlu0 %340, %v29_v3   ;;  %333 = vmatprep.mubr.msk.f32.mxu1 %vm378_vm0, %v377_v11  ;;  %v295_v12 = vld [vmem:[%s488_s0] ss:$0 sm:$0xff]  ;;  %s287_s26 = sshll.u32 %s379_s25, 4  ;;  %s288_s26 = int_to_ptr.vmem [resolvable:$true] %s287_s26 }
   0x8   :  { %v79_v27 = vld [vmem:[%s491_s3] sm:$0xff]  ;;  %s354_s27 = scalar_lea.vmem %s288_s26, 128  ;;  %p359_p1 = scmp.lt.s32.totalorder %s288_s26, %s288_s26 }
   0x9   :  { %v197_v45 = vld [vmem:[%s493_s5] sm:$0x7f]  ;;  %p355_p0 = scmp.ne.s32.totalorder %s288_s26, %s354_s27  ;;  %p360_p2 = scmp.lt.s32.totalorder %s354_s27, %s354_s27 }
   0xa   :  { %60 = vperm.xlu1 %341, %v55_v6  }
   0xb   :  { %65 = vperm.xlu0 %340, %v56_v5   ;;  %p361_p3 = por %p360_p2, %p359_p1 }
   0xd   :  { %p362_p4 = pnand %p361_p3, %p355_p0 }
   0xe   :  { %92 = vperm.xlu1 %341, %v83_v8  }
   0xf   :  { %97 = vperm.xlu0 %340, %v84_v7  }
  0x12   :  { %201 = vperm.xlu1 %341, %v198_v10  }
  0x13   :  { %87 = vperm.xlu0 %340, %v82_v9  }
  0x7d   :  { %v71_v13 = vpop.permute.xlu1 %70 }
  0x7e   :  { %v44_v14 = vpop.permute.xlu0 %43 }
  0x7f   :  { %v54_v15 = vmul.f32 %v295_v12, %v44_v14 }
  0x81   :  { %v75_v16 = vadd.f32 %v71_v13, %v54_v15  ;;  %v34_v18 = vpop.permute.xlu1 %33 }
  0x82   :  { %v39_v17 = vpop.permute.xlu0 %38  ;;  %v52_v20 = vmul.f32 %v295_v12, %v34_v18 }
  0x83   :  { %342 = vtanh.f32 %v75_v16  ;;  %v53_v19 = vmul.f32 %v295_v12, %v39_v17 }
  0x85   :  { %v61_v22 = vpop.permute.xlu1 %60 }
  0x86   :  { %v66_v21 = vpop.permute.xlu0 %65  ;;  %v73_v24 = vadd.f32 %v61_v22, %v52_v20 }
  0x87   :  { %v74_v23 = vadd.f32 %v66_v21, %v53_v19 }
  0x89   :  { %344 = vtanh.f32 %v74_v23  ;;  %v93_v36 = vpop.permute.xlu1 %92 }
  0x8a   :  { %346 = vtanh.f32 %v73_v24  ;;  %v98_v33 = vpop.permute.xlu0 %97 }
  0x8d   :  { %v202_v47 = vpop.permute.xlu1 %201 }
  0x8e   :  { %v88_v40 = vpop.permute.xlu0 %87 }
  0x90   :  { %v343_v25 = vpop.eup %342 }
  0x91   :  { %313 = vmatpush3.msk.msra.mxu0 %vm110_vm1, %v343_v25 }
  0x92   :  { %314 = vmatprep.subr.mxu0 %v377_v11 }
  0x96   :  { %v345_v26 = vpop.eup %344 }
  0x97   :  { %315 = vmatpush3.msra.mxu0 %v345_v26  ;;  %v347_v28 = vpop.eup %346 }
  0x98   :  { %316 = vmatprep.subr.mxu0 %v377_v11 }
  0x99   :  { %317 = vmatpush3.msra.mxu0 %v347_v28 }
  0x9a   :  { %319 = vmatmul.mubr.msk.f32.vlgmr.msra.gmra.mxu0 %vm100_vm2, %v79_v27 }
  0x9b   :  { %321 = vmatprep.mubr.msk.f32.mxu0 %vm378_vm0, %v377_v11 }
  0x9e   :  { %322 = vmatmul.mubr.msk.f32.gmra.mxu0 %vm100_vm2, %v80_v29 }
  0x9f   :  { %324 = vmatprep.mubr.msk.f32.mxu0 %vm378_vm0, %v377_v11 }
  0xa2   :  { %325 = vmatmul.mubr.msk.f32.gmra.mxu0 %vm100_vm2, %v81_v30 }
 0x15a   :  { %v180_v31 = vpop.f32.mrf.mxu0 }
 0x15b   :  { %v181_v42 = vadd.f32 %v180_v31, %v88_v40 }
 0x15c   :  { %v320_v32 = vpop.f32.mrf.mxu0 }
 0x15e   :  { %v185_v34 = vpop.f32.mrf.mxu0 }
 0x15f   :  { %v186_v38 = vadd.f32 %v185_v34, %v93_v36 }
 0x160   :  { %v323_v35 = vpop.f32.mrf.mxu0 }
 0x162   :  { %v190_v37 = vpop.f32.mrf.mxu0 }
 0x163   :  { %v191_v39 = vadd.f32 %v190_v37, %v98_v33 }
 0x164   :  { %v326_v41 = vpop.f32.mrf.mxu0 }
 0x165   :  { %348 = vtanh.f32 %v191_v39 }
 0x166   :  { %350 = vtanh.f32 %v186_v38 }
 0x167   :  { %352 = vtanh.f32 %v181_v42 }
 0x172   :  { %v349_v43 = vpop.eup %348 }
 0x173   :  { %328 = vmatpush3.msk.msra.mxu1 %vm110_vm1, %v349_v43  ;;  %v351_v44 = vpop.eup %350 }
 0x174   :  { %329 = vmatprep.subr.mxu1 %v377_v11  ;;  %v353_v46 = vpop.eup %352 }
 0x175   :  { %330 = vmatpush3.msra.mxu1 %v351_v44 }
 0x176   :  { %331 = vmatprep.subr.mxu1 %v377_v11 }
 0x177   :  { %332 = vmatpush3.msra.mxu1 %v353_v46 }
 0x178   :  { %334 = vmatmul.mubr.msk.f32.vlgmr.msra.gmra.mxu1 %vm100_vm2, %v197_v45 }
 0x238   :  { %v276_v48 = vpop.f32.mrf.mxu1 }
 0x239   :  { %v277_v49 = vadd.f32 %v276_v48, %v202_v47 }
 0x23a   :  { %v335_v50 = vpop.f32.mrf.mxu1 }
 0x23b   :  { %280 = vst [vmem:[#allocation2] sm:$0x7f] %v277_v49 }
 0x23c   :  { %365 = shalt.err (!%p362_p4)
}
 0x23d   :  { %290 = dma.vmem_to_hbm [thread:$0]  %s288_s26, 128, %s495_s7, [#allocation3]  }
 0x23e   :  { %374 = dma.done.wait [#allocation3], 128  }
 0x23f   :  { %375 = vsyncadd [#allocation3], 4294967168 }
 0x240   :  { %294 = vsyncpa [#allocation3], 1 }

</bundles_post_ra>
